<compile_context>
chip_gen: v6e
topology: v6e:2x2x1
jax: 0.10.0
libtpu: 0.0.40
codegen_flags: <defaults>
</compile_context>

<pallas_src>
import numpy as np
import jax
import jax.numpy as jnp
from jax.experimental import pallas as pl
from jax.experimental.pallas import tpu as pltpu

# "config.n_fft" — deterministic choice for this synthetic kernel.
N_FFT = 64
HOP = N_FFT // 2                 # torchaudio default hop_length = n_fft // 2
N_FREQ = N_FFT // 2 + 1          # onesided=True -> 33
HALF = 64                        # lane-padded per-component width (re | im)
MAX_TILE_M = 2048                # sized for v7x's smaller VMEM; plenty of headroom


def logspec_kernel(frames_ref, wcat_ref, out_ref):
    # frames_ref: (tile_m, n_fft) bf16  — window already folded into wcat.
    # wcat_ref:   (n_fft, 2*HALF) bf16  — [win*cos | win*(-sin)], zero-padded.
    # out_ref:    (tile_m, HALF)  f32
    y = jnp.dot(frames_ref[...], wcat_ref[...],
                preferred_element_type=jnp.float32)          # single MXU pass
    re = y[:, :HALF]
    im = y[:, HALF:]
    mag = jnp.sqrt(re * re + im * im)                        # |STFT|, power=1 (f32)
    out_ref[...] = jnp.log1p(mag)                            # log(1 + spec)


def _fused_basis():
    # DFT real/imag bases with the periodic Hann window folded in, zero-padded
    # on the lane axis to 2*HALF = 128 (re -> lanes 0..63, im -> lanes 64..127).
    n = np.arange(N_FFT)
    k = np.arange(N_FREQ)
    ang = 2.0 * np.pi * np.outer(n, k) / N_FFT               # (n_fft, n_freq)
    win = 0.5 * (1.0 - np.cos(2.0 * np.pi * n / N_FFT))      # hann(periodic=True)
    wr = win[:, None] * np.cos(ang)
    wi = win[:, None] * (-np.sin(ang))
    wcat = np.zeros((N_FFT, 2 * HALF), dtype=np.float32)
    wcat[:, :N_FREQ] = wr
    wcat[:, HALF:HALF + N_FREQ] = wi
    return jnp.asarray(wcat, dtype=jnp.bfloat16)


def _frame(x, B, T):
    # x: (B, T + n_fft) reflect-padded waveform -> (B, num_frames, n_fft)
    num_frames = 1 + T // HOP
    if T % HOP == 0:
        # 50%-overlap framing via two static slices of a (.., HOP) view — no gather.
        halves = x.reshape(B, T // HOP + 2, HOP)
        frames = jnp.concatenate([halves[:, :-1, :], halves[:, 1:, :]], axis=-1)
    else:
        # TODO(synk): ragged hop (T % HOP != 0) — gather fallback.
        idx = jnp.arange(num_frames)[:, None] * HOP + jnp.arange(N_FFT)[None, :]
        frames = x[:, idx]
    return frames, num_frames


def log_spectrogram(waveform):
    """waveform: (B, T) float32 -> (B, n_freq, num_frames) float32."""
    B, T = waveform.shape
    pad = N_FFT // 2
    # center=True with reflect padding (torchaudio Spectrogram default) — glue.
    x = jnp.pad(waveform.astype(jnp.float32), ((0, 0), (pad, pad)), mode="reflect")
    frames, num_frames = _frame(x, B, T)

    M = B * num_frames
    frames = frames.reshape(M, N_FFT).astype(jnp.bfloat16)

    # Row tiling: 8-sublane aligned, capped at MAX_TILE_M; pad rows so the grid divides.
    m8 = (M + 7) // 8 * 8
    tile_m = min(MAX_TILE_M, m8)
    m_pad = (m8 + tile_m - 1) // tile_m * tile_m
    if m_pad != M:
        frames = jnp.pad(frames, ((0, m_pad - M), (0, 0)))

    wcat = _fused_basis()

    out = pl.pallas_call(
        logspec_kernel,
        out_shape=jax.ShapeDtypeStruct((m_pad, HALF), jnp.float32),
        grid_spec=pltpu.PrefetchScalarGridSpec(
            num_scalar_prefetch=0,
            grid=(m_pad // tile_m,),
            in_specs=[
                pl.BlockSpec((tile_m, N_FFT), lambda i: (i, 0)),    # frame rows
                pl.BlockSpec((N_FFT, 2 * HALF), lambda i: (0, 0)),  # basis (untiled)
            ],
            out_specs=pl.BlockSpec((tile_m, HALF), lambda i: (i, 0)),
        ),
        compiler_params=pltpu.CompilerParams(
            dimension_semantics=("parallel",)),
    )(frames, wcat)

    out = out[:M, :N_FREQ].reshape(B, num_frames, N_FREQ)
    return jnp.transpose(out, (0, 2, 1))                     # (B, n_freq, F)


if __name__ == "__main__":
    key = jax.random.PRNGKey(0)
    B, T = 2, 256                                            # small example shapes
    waveform = jax.random.normal(key, (B, T), dtype=jnp.float32)

    result = log_spectrogram(waveform)
    jax.block_until_ready(result)

    num_frames = 1 + T // HOP
    assert result.shape == (B, N_FREQ, num_frames), result.shape
    assert result.dtype == jnp.float32

    # Light numeric sanity check vs. a pure-JAX f32 reference (bf16 matmul inputs
    # in the kernel -> loose tolerance).
    pad = N_FFT // 2
    xr = jnp.pad(waveform, ((0, 0), (pad, pad)), mode="reflect")
    idx = jnp.arange(num_frames)[:, None] * HOP + jnp.arange(N_FFT)[None, :]
    fr = xr[:, idx]
    n = np.arange(N_FFT)
    win = jnp.asarray(0.5 * (1.0 - np.cos(2.0 * np.pi * n / N_FFT)), jnp.float32)
    ang = 2.0 * np.pi * np.outer(n, np.arange(N_FREQ)) / N_FFT
    wr = jnp.asarray(np.cos(ang), jnp.float32)
    wi = jnp.asarray(-np.sin(ang), jnp.float32)
    fw = fr * win
    re = jnp.einsum("bfn,nk->bfk", fw, wr)
    im = jnp.einsum("bfn,nk->bfk", fw, wi)
    ref = jnp.transpose(jnp.log1p(jnp.sqrt(re * re + im * im)), (0, 2, 1))
    err = float(jnp.max(jnp.abs(result - ref)))
    assert err < 0.1, f"max abs err {err}"

    print("KERNEL_OK")
</pallas_src>

<mosaic_0001>
module attributes {stable_mosaic.version = 11 : i64} {
  func.func @logspec_kernel(%arg0: i32, %arg1: memref<24x64xbf16, #tpu.memory_space<vmem>>, %arg2: memref<64x128xbf16, #tpu.memory_space<vmem>>, %arg3: memref<24x64xf32, #tpu.memory_space<vmem>>) attributes {dimension_semantics = [#tpu.dimension_semantics<parallel>], iteration_bounds = array<i64: 1>, scalar_prefetch = 0 : i64, scratch_operands = 0 : i64, tpu.core_type = #tpu.core_type<tc>, window_params = [{transform_indices = @transform_0, window_bounds = array<i64: 24, 64>}, {pipeline_mode = #tpu.pipeline_mode<synchronous>, transform_indices = @transform_1, window_bounds = array<i64: 64, 128>}, {transform_indices = @transform_2, window_bounds = array<i64: 24, 64>}]} {
    %c0 = arith.constant 0 : index
    %c0_0 = arith.constant 0 : index
    %0 = vector.load %arg1[%c0, %c0_0] : memref<24x64xbf16, #tpu.memory_space<vmem>>, vector<24x64xbf16>
    %c0_1 = arith.constant 0 : index
    %c0_2 = arith.constant 0 : index
    %1 = vector.load %arg2[%c0_1, %c0_2] : memref<64x128xbf16, #tpu.memory_space<vmem>>, vector<64x128xbf16>
    %cst = arith.constant dense<0.000000e+00> : vector<24x128xf32>
    %2 = tpu.matmul %0, %1, %cst {dimension_numbers = #tpu.dot_dimension_numbers<[1], [0], [0], [1], [0, 0, 1, 1], [], []>} : vector<24x64xbf16>, vector<64x128xbf16>, vector<24x128xf32> -> vector<24x128xf32>
    %3 = vector.extract_strided_slice %2 {offsets = [0, 0], sizes = [24, 64], strides = [1, 1]} : vector<24x128xf32> to vector<24x64xf32>
    %4 = vector.extract_strided_slice %2 {offsets = [0, 64], sizes = [24, 64], strides = [1, 1]} : vector<24x128xf32> to vector<24x64xf32>
    %5 = arith.mulf %3, %3 : vector<24x64xf32>
    %6 = arith.mulf %4, %4 : vector<24x64xf32>
    %7 = arith.addf %5, %6 : vector<24x64xf32>
    %8 = math.sqrt %7 : vector<24x64xf32>
    %9 = math.log1p %8 : vector<24x64xf32>
    %c0_3 = arith.constant 0 : index
    %c0_4 = arith.constant 0 : index
    %10 = vector.load %arg3[%c0_3, %c0_4] : memref<24x64xf32, #tpu.memory_space<vmem>>, vector<24x64xf32>
    tpu.vector_store %arg3[%c0_3, %c0_4], %9 {strides = array<i32>} : memref<24x64xf32, #tpu.memory_space<vmem>>, vector<24x64xf32>,
    return
  }
  func.func @transform_0(%arg0: i32) -> (i32, i32) {
    %c0_i32 = arith.constant 0 : i32
    %c0_i32_0 = arith.constant 0 : i32
    return %arg0, %c0_i32 : i32, i32
  }
  func.func @transform_1(%arg0: i32) -> (i32, i32) {
    %c0_i32 = arith.constant 0 : i32
    %c0_i32_0 = arith.constant 0 : i32
    %c0_i32_1 = arith.constant 0 : i32
    return %c0_i32, %c0_i32_0 : i32, i32
  }
  func.func @transform_2(%arg0: i32) -> (i32, i32) {
    %c0_i32 = arith.constant 0 : i32
    %c0_i32_0 = arith.constant 0 : i32
    return %arg0, %c0_i32 : i32, i32
  }
}

</mosaic_0001>

<bundles_post_ra>
// kernel: tpu_custom_call.1
= control target key start
LH: loop header
LB: loop body
LE: loop exit
PB: predicated region body
PF: predicated region fallthrough
CT: control target
= control target key end

     0   :  { %7 = vsyncpa [#allocation3], 0  ;;  %s386_s0 = inlined_call_operand.hbm [shape: bf16[24,64], index: 0, kind: input, shape index: {}]   ;;  %s387_s1 = inlined_call_operand.hbm [shape: bf16[64,128], index: 1, kind: input, shape index: {}]   ;;  %s388_s2 = inlined_call_operand.hbm [shape: f32[24,64], index: 2, kind: output, shape index: {}]  }
   0x1   :  { %8 = vsyncpa [#allocation6], 0 }
   0x2   :  { %9 = vsyncpa [#allocation4], 0  ;;  %s343_s9 = smov [#allocation2]  }
   0x3   :  { %s15_s10 = sshll.u32 %s343_s9, 4  ;;  %s16_s10 = int_to_ptr.vmem [resolvable:$true] %s15_s10 }
   0x4   :  { %s285_s11 = scalar_lea.vmem %s16_s10, 192  ;;  %p290_p1 = scmp.lt.s32.totalorder %s16_s10, %s16_s10 }
   0x5   :  { %p286_p0 = scmp.ne.s32.totalorder %s16_s10, %s285_s11  ;;  %p291_p2 = scmp.lt.s32.totalorder %s285_s11, %s285_s11 }
   0x7   :  { %p292_p3 = por %p291_p2, %p290_p1 }
   0x9   :  { %p293_p4 = pnand %p292_p3, %p286_p0 }
   0xb   :  { %296 = shalt.err (!%p293_p4)
}
   0xc   :  { %s344_s12 = smov 64   ;;  %s345_s13 = smov 4  }
   0xd   :  { %21 = dma.hbm_to_vmem [thread:$0]  %s386_s0, 192, %s16_s10, [#allocation3], %s344_s12, %s344_s12, %s345_s13  }
   0xe   :  { %s346_s16 = smov [#allocation5]  }
   0xf   :  { %s27_s17 = sshll.u32 %s346_s16, 4  ;;  %s28_s17 = int_to_ptr.vmem [resolvable:$true] %s27_s17 }
  0x10   :  { %s305_s18 = scalar_lea.vmem %s28_s17, 512  ;;  %p310_p6 = scmp.lt.s32.totalorder %s28_s17, %s28_s17 }
  0x11   :  { %p306_p5 = scmp.ne.s32.totalorder %s28_s17, %s305_s18  ;;  %p311_p7 = scmp.lt.s32.totalorder %s305_s18, %s305_s18 }
  0x13   :  { %p312_p8 = por %p311_p7, %p310_p6 }
  0x15   :  { %p313_p9 = pnand %p312_p8, %p306_p5 }
  0x17   :  { %316 = shalt.err (!%p313_p9)
}
  0x18   :  { %33 = dma.hbm_to_vmem [thread:$0]  %s387_s1, 512, %s28_s17, [#allocation6], %s344_s12, %s344_s12, %s345_s13  }
  0x19   :  { %337 = dma.done.wait [#allocation3], 192  }
  0x1a   :  { %338 = vsyncadd [#allocation3], 4294967104 }
  0x1b   :  { %339 = dma.done.wait [#allocation6], 512  }
  0x1c   :  { %340 = vsyncadd [#allocation6], 4294966784  ;;  %v259_v0 = vld [vmem:[#allocation5 + $0x18] sm:$0xff]   ;;  %v260_v1 = vld [vmem:[#allocation5 + $0x10] sm:$0xff]   ;;  %vm84_vm0 = vcmask 523264   ;;  %s347_s0 = smov [#allocation7]  }
  0x1d   :  { %240 = vmatprep.subr.bf16.mxu0 %v259_v0  ;;  %v261_v2 = vld [vmem:[#allocation5 + $0x8] sm:$0xff]   ;;  %v263_v3 = vld [vmem:[#allocation2] sm:$0xff]   ;;  %v262_v4 = vld [vmem:[#allocation5] sm:$0xff]   ;;  %s213_s1 = sshll.u32 %s347_s0, 4  ;;  %s214_s1 = int_to_ptr.vmem [resolvable:$true] %s213_s1 }
  0x1e   :  { %241 = vmatpush3.bf16.msra.mxu0 %v259_v0  ;;  %248 = vmatprep.mubr.msk.bf16.mxu0 %vm84_vm0, %v263_v3  ;;  %v264_v5 = vld [vmem:[#allocation2 + $0x8] ss:$0 sps:$4 sm:$0xff]   ;;  %s317_s21 = scalar_lea.vmem %s214_s1, 384  ;;  %p322_p11 = scmp.lt.s32.totalorder %s214_s1, %s214_s1 }
  0x1f   :  { %242 = vmatprep.subr.bf16.mxu0 %v260_v1  ;;  %p318_p10 = scmp.ne.s32.totalorder %s214_s1, %s317_s21  ;;  %p323_p12 = scmp.lt.s32.totalorder %s317_s21, %s317_s21 }
  0x21   :  { %p324_p13 = por %p323_p12, %p322_p11 }
  0x22   :  { %243 = vmatpush3.bf16.msra.mxu0 %v260_v1 }
  0x23   :  { %244 = vmatprep.subr.bf16.mxu0 %v261_v2  ;;  %p325_p0 = pnand %p324_p13, %p318_p10 }
  0x26   :  { %245 = vmatpush3.bf16.msra.mxu0 %v261_v2 }
  0x27   :  { %246 = vmatprep.subr.bf16.mxu0 %v262_v4 }
  0x2a   :  { %247 = vmatpush3.bf16.msra.mxu0 %v262_v4 }
  0x2d   :  { %249 = vmatmul.mubr.msk.bf16.vlgmr.msra.gmra.mxu0 %vm84_vm0, %v264_v5 }
  0xed   :  { %v250_v6 = vpop.f32.mrf.mxu0 }
  0xee   :  { %v141_v7 = vmul.f32 %v250_v6, %v250_v6 }
  0xef   :  { %v125_v8 = vpop.f32.mrf.mxu0 }
  0xf0   :  { %v139_v9 = vmul.f32 %v125_v8, %v125_v8  ;;  %149 = vrot.lane.b32.xlu1 %v141_v7, %s344_s12 }
  0xf1   :  { %v251_v10 = vpop.f32.mrf.mxu0 }
  0xf2   :  { %145 = vrot.lane.b32.xlu0 %v139_v9, %s344_s12 }
  0xf3   :  { %v128_v11 = vpop.f32.mrf.mxu0 }
  0xf4   :  { %v140_v12 = vmul.f32 %v128_v11, %v128_v11 }
  0xf6   :  { %147 = vrot.lane.b32.xlu0 %v140_v12, %s344_s12 }
 0x162   :  { %v150_v13 = vpop.permute.xlu1 %149 }
 0x163   :  { %v156_v14 = vadd.f32 %v150_v13, %v141_v7 }
 0x164   :  { %v146_v15 = vpop.permute.xlu0 %145 }
 0x165   :  { %265 = vrsqrt.f32 %v156_v14  ;;  %v154_v16 = vadd.f32 %v146_v15, %v139_v9  ;;  %vm173_vm1 = vcmp.eq.f32.partialorder %v156_v14, inf  ;;  %v176_v21 = vand.u32 2147483648, %v156_v14 }
 0x166   :  { %vm175_vm2 = vcmp.eq.f32.partialorder %v156_v14, 0.0 }
 0x167   :  { %267 = vrsqrt.f32 %v154_v16  ;;  %vm159_vm3 = vcmp.eq.f32.partialorder %v154_v16, inf  ;;  %v162_v26 = vand.u32 2147483648, %v154_v16  ;;  %vm161_vm4 = vcmp.eq.f32.partialorder %v154_v16, 0.0 }
 0x168   :  { %v148_v17 = vpop.permute.xlu0 %147 }
 0x169   :  { %v155_v18 = vadd.f32 %v148_v17, %v140_v12 }
 0x16b   :  { %269 = vrsqrt.f32 %v155_v18  ;;  %vm166_vm5 = vcmp.eq.f32.partialorder %v155_v18, inf  ;;  %v169_v32 = vand.u32 2147483648, %v155_v18  ;;  %vm168_vm6 = vcmp.eq.f32.partialorder %v155_v18, 0.0 }
 0x172   :  { %v266_v19 = vpop.eup %265 }
 0x173   :  { %v172_v20 = vmul.f32 %v266_v19, %v156_v14 }
 0x174   :  { %v268_v22 = vpop.eup %267 }
 0x175   :  { %v174_v23 = vsel %vm173_vm1, %v156_v14, %v172_v20  ;;  %v158_v24 = vmul.f32 %v268_v22, %v154_v16 }
 0x176   :  { %v177_v25 = vsel %vm175_vm2, %v176_v21, %v174_v23 }
 0x177   :  { %v196_v27 = vadd.f32 1.0, %v177_v25  ;;  %v160_v29 = vsel %vm159_vm3, %v154_v16, %v158_v24  ;;  %v199_v37 = vmul.f32 -0.5, %v177_v25  ;;  %v202_v40 = vand.u32 2147483647, %v177_v25 }
 0x178   :  { %v270_v28 = vpop.eup %269  ;;  %v163_v31 = vsel %vm161_vm4, %v162_v26, %v160_v29 }
 0x179   :  { %v165_v30 = vmul.f32 %v270_v28, %v155_v18  ;;  %271 = vlog2.f32 %v196_v27  ;;  %v178_v33 = vadd.f32 1.0, %v163_v31  ;;  %v181_v38 = vmul.f32 -0.5, %v163_v31 }
 0x17a   :  { %v200_v39 = vadd.f32 1.0, %v199_v37  ;;  %v184_v44 = vand.u32 2147483647, %v163_v31  ;;  %vm203_vm7 = vcmp.lt.f32.partialorder %v202_v40, 0.0004427343 }
 0x17b   :  { %v167_v34 = vsel %vm166_vm5, %v155_v18, %v165_v30  ;;  %273 = vlog2.f32 %v178_v33  ;;  %v182_v43 = vadd.f32 1.0, %v181_v38 }
 0x17c   :  { %v170_v35 = vsel %vm168_vm6, %v169_v32, %v167_v34  ;;  %v201_v46 = vmul.f32 %v200_v39, %v177_v25  ;;  %vm185_vm8 = vcmp.lt.f32.partialorder %v184_v44, 0.0004427343 }
 0x17d   :  { %v187_v36 = vadd.f32 1.0, %v170_v35  ;;  %v190_v41 = vmul.f32 -0.5, %v170_v35  ;;  %v183_v51 = vmul.f32 %v182_v43, %v163_v31  ;;  %v193_v52 = vand.u32 2147483647, %v170_v35 }
 0x17f   :  { %275 = vlog2.f32 %v187_v36  ;;  %v191_v48 = vadd.f32 1.0, %v190_v41  ;;  %vm194_vm9 = vcmp.lt.f32.partialorder %v193_v52, 0.0004427343 }
 0x181   :  { %v192_v56 = vmul.f32 %v191_v48, %v170_v35 }
 0x186   :  { %v272_v42 = vpop.eup %271 }
 0x187   :  { %v198_v45 = vmul.f32 0.6931472, %v272_v42 }
 0x188   :  { %v274_v47 = vpop.eup %273 }
 0x189   :  { %v204_v49 = vsel %vm203_vm7, %v201_v46, %v198_v45  ;;  %v180_v50 = vmul.f32 0.6931472, %v274_v47 }
 0x18a   :  { %207 = vst.msk [vmem:[#allocation7 + $0x10] sm:$0xff] %vm84_vm0, %v204_v49 }
 0x18b   :  { %v186_v54 = vsel %vm185_vm8, %v183_v51, %v180_v50 }
 0x18c   :  { %v276_v53 = vpop.eup %275  ;;  %205 = vst.msk [vmem:[#allocation7] sm:$0xff] %vm84_vm0, %v186_v54 }
 0x18d   :  { %v189_v55 = vmul.f32 0.6931472, %v276_v53 }
 0x18f   :  { %v195_v57 = vsel %vm194_vm9, %v192_v56, %v189_v55 }
 0x190   :  { %206 = vst.msk [vmem:[#allocation7 + $0x8] sm:$0xff] %vm84_vm0, %v195_v57 }
 0x191   :  { %328 = shalt.err (!%p325_p0)
}
 0x192   :  { %s348_s22 = smov 128   ;;  %s349_s23 = smov 8  }
 0x193   :  { %219 = dma.vmem_to_hbm [thread:$0]  %s214_s1, 384, %s388_s2, [#allocation4], %s348_s22, %s348_s22, %s349_s23  }
 0x194   :  { %341 = dma.done.wait [#allocation4], 384  }
 0x195   :  { %342 = vsyncadd [#allocation4], 4294966912 }
 0x196   :  { %223 = vsyncpa [#allocation3], 1 }
 0x197   :  { %224 = vsyncpa [#allocation6], 1 }
 0x198   :  { %225 = vsyncpa [#allocation4], 1 }

</bundles_post_ra>
